<compile_context>
chip_gen: v7x
topology: tpu7x:2x2x1
jax: 0.10.0
libtpu: 0.0.40
codegen_flags: <defaults>
</compile_context>

<pallas_src>
import math
import jax
import jax.numpy as jnp
from jax.experimental import pallas as pl
from jax.experimental.pallas import tpu as pltpu

NEG_SLOPE = 0.01     # nn.LeakyReLU default
BN_EPS = 1e-5        # nn.BatchNorm1d default
LANE = 128
SUBLANE = 8


def _round_up(n, m):
    return ((n + m - 1) // m) * m


def encoder3_kernel(x_ref,
                    w1_ref, c1_ref,
                    w2_ref, c2_ref,
                    w3_ref, c3_ref,
                    o_ref):
    # ---- layer 1: Linear+BN folded into (w1, c1); Dropout(eval)=id; LeakyReLU
    h = jnp.dot(x_ref[...], w1_ref[...], preferred_element_type=jnp.float32)
    h = h + c1_ref[...]
    h = jnp.where(h >= 0.0, h, NEG_SLOPE * h)

    # ---- layer 2
    h = jnp.dot(h.astype(w2_ref.dtype), w2_ref[...],
                preferred_element_type=jnp.float32)
    h = h + c2_ref[...]
    h = jnp.where(h >= 0.0, h, NEG_SLOPE * h)

    # ---- layer 3: Linear+BN only (no dropout / no activation)
    h = jnp.dot(h.astype(w3_ref.dtype), w3_ref[...],
                preferred_element_type=jnp.float32)
    h = h + c3_ref[...]

    o_ref[...] = h.astype(o_ref.dtype)


def _kaiming_uniform(key, out_f, in_f):
    # nn.init.kaiming_uniform_ default (a=0, fan_in, leaky_relu): bound = sqrt(6/fan_in)
    bound = math.sqrt(6.0 / in_f)
    return jax.random.uniform(key, (out_f, in_f), jnp.float32, -bound, bound)


def init_encoder3_params(key, in_shape, layer1, layer2, layer3):
    # Matches Encoder3.random_init(): kaiming_uniform_ weights, zeroed biases,
    # BatchNorm defaults (gamma=1, beta=0, running_mean=0, running_var=1).
    ks = jax.random.split(key, 3)
    dims = [(layer1, in_shape), (layer2, layer1), (layer3, layer2)]
    params = {}
    for i, ((out_f, in_f), k) in enumerate(zip(dims, ks), start=1):
        params[f"w{i}"] = _kaiming_uniform(k, out_f, in_f)          # PyTorch layout [out, in]
        params[f"b{i}"] = jnp.zeros((out_f,), jnp.float32)
        params[f"gamma{i}"] = jnp.ones((out_f,), jnp.float32)
        params[f"beta{i}"] = jnp.zeros((out_f,), jnp.float32)
        params[f"rmean{i}"] = jnp.zeros((out_f,), jnp.float32)
        params[f"rvar{i}"] = jnp.ones((out_f,), jnp.float32)
    return params


def _bn_scale_shift(gamma, beta, rmean, rvar):
    scale = gamma * jax.lax.rsqrt(rvar + BN_EPS)
    shift = beta - rmean * scale
    return scale, shift


def encoder3_forward(x, params, *, tb=None, use_bf16=False):
    B, D0 = x.shape
    D1 = params["w1"].shape[0]
    D2 = params["w2"].shape[0]
    D3 = params["w3"].shape[0]

    # Lane-pad every feature dim to a multiple of 128 (zero padding is exact:
    # zero columns stay zero through the folded affine + LeakyReLU and feed
    # zero weight rows in the next layer).
    D0p, D1p, D2p, D3p = (_round_up(d, LANE) for d in (D0, D1, D2, D3))

    # Batch tiling: big tiles (up to 512 rows), multiple of 8, and keep at
    # least 2 "parallel" grid steps when possible (v7x has 2 TensorCores).
    Bp8 = _round_up(B, SUBLANE)
    if tb is None:
        tb = min(Bp8, 512)
        if Bp8 // tb < 2 and Bp8 >= 2 * SUBLANE:
            tb = _round_up(Bp8 // 2, SUBLANE)
    tb = max(SUBLANE, _round_up(int(tb), SUBLANE))
    Bp = _round_up(Bp8, tb)
    grid = Bp // tb

    compute_dtype = jnp.bfloat16 if use_bf16 else jnp.float32

    # Pad + cast activations.
    xp = jnp.zeros((Bp, D0p), compute_dtype).at[:B, :D0].set(x.astype(compute_dtype))

    # Parameter glue (plain JAX, one-time constant folding):
    #   y = (x @ W.T + b) * s + t  ==  x @ (W.T * s) + (b*s + t)
    ins = [xp]
    specs = [pl.BlockSpec((tb, D0p), lambda i: (i, 0))]
    in_dims = (D0p, D1p, D2p)
    out_dims = (D1p, D2p, D3p)
    for li, din, dout in zip((1, 2, 3), in_dims, out_dims):
        w = params[f"w{li}"]                                  # [out, in]
        b = params[f"b{li}"]
        s, t = _bn_scale_shift(params[f"gamma{li}"], params[f"beta{li}"],
                               params[f"rmean{li}"], params[f"rvar{li}"])
        w_folded = (w * s[:, None]).T                         # [in, out], BN scale folded
        c_folded = b * s + t                                  # [out]
        wp = jnp.zeros((din, dout), compute_dtype).at[
            :w.shape[1], :w.shape[0]].set(w_folded.astype(compute_dtype))
        cp = jnp.zeros((1, dout), jnp.float32).at[0, :w.shape[0]].set(c_folded)
        ins += [wp, cp]
        specs += [pl.BlockSpec((din, dout), lambda i: (0, 0)),
                  pl.BlockSpec((1, dout), lambda i: (0, 0))]

    out = pl.pallas_call(
        encoder3_kernel,
        out_shape=jax.ShapeDtypeStruct((Bp, D3p), jnp.float32),
        grid_spec=pltpu.PrefetchScalarGridSpec(
            num_scalar_prefetch=0,
            grid=(grid,),
            in_specs=specs,
            out_specs=pl.BlockSpec((tb, D3p), lambda i: (i, 0)),
        ),
        compiler_params=pltpu.CompilerParams(
            dimension_semantics=("parallel",)),
    )(*ins)
    return out[:B, :D3].astype(x.dtype)


def encoder3_reference(x, params):
    h = x.astype(jnp.float32)
    for li in (1, 2, 3):
        h = h @ params[f"w{li}"].T + params[f"b{li}"]
        s, t = _bn_scale_shift(params[f"gamma{li}"], params[f"beta{li}"],
                               params[f"rmean{li}"], params[f"rvar{li}"])
        h = h * s + t
        if li != 3:
            h = jnp.where(h >= 0.0, h, NEG_SLOPE * h)
    return h.astype(x.dtype)


if __name__ == "__main__":
    in_shape, layer1, layer2, layer3 = 32, 64, 32, 16
    batch = 16
    dropout = 0.1  # inference mode -> identity

    key = jax.random.PRNGKey(0)
    kx, kp = jax.random.split(key)
    x = jax.random.normal(kx, (batch, in_shape), jnp.float32)
    params = init_encoder3_params(kp, in_shape, layer1, layer2, layer3)

    ref = encoder3_reference(x, params)

    # f32 path (tight tolerance).
    out = jax.block_until_ready(encoder3_forward(x, params))
    assert out.shape == (batch, layer3)
    assert jnp.allclose(out, ref, atol=1e-4, rtol=1e-4), "f32 mismatch vs reference"

    # bf16-operand path (MXU-native on v6e/v7x; f32 accumulation) -> looser tolerance.
    out_bf16 = jax.block_until_ready(encoder3_forward(x, params, use_bf16=True))
    assert out_bf16.shape == (batch, layer3)
    assert jnp.allclose(out_bf16, ref, atol=1.5e-1, rtol=1e-1), "bf16 mismatch vs reference"

    print("KERNEL_OK")
</pallas_src>

<mosaic_0001>
module attributes {stable_mosaic.version = 11 : i64} {
  func.func @encoder3_kernel(%arg0: i32, %arg1: memref<8x128xf32, #tpu.memory_space<vmem>>, %arg2: memref<128x128xf32, #tpu.memory_space<vmem>>, %arg3: memref<1x128xf32, #tpu.memory_space<vmem>>, %arg4: memref<128x128xf32, #tpu.memory_space<vmem>>, %arg5: memref<1x128xf32, #tpu.memory_space<vmem>>, %arg6: memref<128x128xf32, #tpu.memory_space<vmem>>, %arg7: memref<1x128xf32, #tpu.memory_space<vmem>>, %arg8: memref<8x128xf32, #tpu.memory_space<vmem>>) attributes {dimension_semantics = [#tpu.dimension_semantics<parallel>], iteration_bounds = array<i64: 2>, scalar_prefetch = 0 : i64, scratch_operands = 0 : i64, tpu.core_type = #tpu.core_type<tc>, window_params = [{transform_indices = @transform_0, window_bounds = array<i64: 8, 128>}, {pipeline_mode = #tpu.pipeline_mode<synchronous>, transform_indices = @transform_1, window_bounds = array<i64: 128, 128>}, {pipeline_mode = #tpu.pipeline_mode<synchronous>, transform_indices = @transform_2, window_bounds = array<i64: 1, 128>}, {pipeline_mode = #tpu.pipeline_mode<synchronous>, transform_indices = @transform_3, window_bounds = array<i64: 128, 128>}, {pipeline_mode = #tpu.pipeline_mode<synchronous>, transform_indices = @transform_4, window_bounds = array<i64: 1, 128>}, {pipeline_mode = #tpu.pipeline_mode<synchronous>, transform_indices = @transform_5, window_bounds = array<i64: 128, 128>}, {pipeline_mode = #tpu.pipeline_mode<synchronous>, transform_indices = @transform_6, window_bounds = array<i64: 1, 128>}, {transform_indices = @transform_7, window_bounds = array<i64: 8, 128>}]} {
    %c0 = arith.constant 0 : index
    %c0_0 = arith.constant 0 : index
    %0 = vector.load %arg1[%c0, %c0_0] : memref<8x128xf32, #tpu.memory_space<vmem>>, vector<8x128xf32>
    %c0_1 = arith.constant 0 : index
    %c0_2 = arith.constant 0 : index
    %1 = vector.load %arg2[%c0_1, %c0_2] : memref<128x128xf32, #tpu.memory_space<vmem>>, vector<128x128xf32>
    %cst = arith.constant dense<0.000000e+00> : vector<8x128xf32>
    %2 = tpu.matmul %0, %1, %cst {dimension_numbers = #tpu.dot_dimension_numbers<[1], [0], [0], [1], [0, 0, 1, 1], [], []>} : vector<8x128xf32>, vector<128x128xf32>, vector<8x128xf32> -> vector<8x128xf32>
    %c0_3 = arith.constant 0 : index
    %c0_4 = arith.constant 0 : index
    %3 = vector.load %arg3[%c0_3, %c0_4] : memref<1x128xf32, #tpu.memory_space<vmem>>, vector<1x128xf32>
    %4 = vector.broadcast %3 : vector<1x128xf32> to vector<8x128xf32>
    %5 = arith.addf %2, %4 : vector<8x128xf32>
    %cst_5 = arith.constant 0.000000e+00 : f32
    %6 = vector.broadcast %cst_5 : f32 to vector<8x128xf32>
    %7 = arith.cmpf oge, %5, %6 : vector<8x128xf32>
    %cst_6 = arith.constant 0.00999999977 : f32
    %8 = vector.broadcast %cst_6 : f32 to vector<8x128xf32>
    %9 = arith.mulf %8, %5 : vector<8x128xf32>
    %10 = arith.select %7, %5, %9 : vector<8x128xi1>, vector<8x128xf32>
    %c0_7 = arith.constant 0 : index
    %c0_8 = arith.constant 0 : index
    %11 = vector.load %arg4[%c0_7, %c0_8] : memref<128x128xf32, #tpu.memory_space<vmem>>, vector<128x128xf32>
    %cst_9 = arith.constant dense<0.000000e+00> : vector<8x128xf32>
    %12 = tpu.matmul %10, %11, %cst_9 {dimension_numbers = #tpu.dot_dimension_numbers<[1], [0], [0], [1], [0, 0, 1, 1], [], []>} : vector<8x128xf32>, vector<128x128xf32>, vector<8x128xf32> -> vector<8x128xf32>
    %c0_10 = arith.constant 0 : index
    %c0_11 = arith.constant 0 : index
    %13 = vector.load %arg5[%c0_10, %c0_11] : memref<1x128xf32, #tpu.memory_space<vmem>>, vector<1x128xf32>
    %14 = vector.broadcast %13 : vector<1x128xf32> to vector<8x128xf32>
    %15 = arith.addf %12, %14 : vector<8x128xf32>
    %cst_12 = arith.constant 0.000000e+00 : f32
    %16 = vector.broadcast %cst_12 : f32 to vector<8x128xf32>
    %17 = arith.cmpf oge, %15, %16 : vector<8x128xf32>
    %cst_13 = arith.constant 0.00999999977 : f32
    %18 = vector.broadcast %cst_13 : f32 to vector<8x128xf32>
    %19 = arith.mulf %18, %15 : vector<8x128xf32>
    %20 = arith.select %17, %15, %19 : vector<8x128xi1>, vector<8x128xf32>
    %c0_14 = arith.constant 0 : index
    %c0_15 = arith.constant 0 : index
    %21 = vector.load %arg6[%c0_14, %c0_15] : memref<128x128xf32, #tpu.memory_space<vmem>>, vector<128x128xf32>
    %cst_16 = arith.constant dense<0.000000e+00> : vector<8x128xf32>
    %22 = tpu.matmul %20, %21, %cst_16 {dimension_numbers = #tpu.dot_dimension_numbers<[1], [0], [0], [1], [0, 0, 1, 1], [], []>} : vector<8x128xf32>, vector<128x128xf32>, vector<8x128xf32> -> vector<8x128xf32>
    %c0_17 = arith.constant 0 : index
    %c0_18 = arith.constant 0 : index
    %23 = vector.load %arg7[%c0_17, %c0_18] : memref<1x128xf32, #tpu.memory_space<vmem>>, vector<1x128xf32>
    %24 = vector.broadcast %23 : vector<1x128xf32> to vector<8x128xf32>
    %25 = arith.addf %22, %24 : vector<8x128xf32>
    %c0_19 = arith.constant 0 : index
    %c0_20 = arith.constant 0 : index
    %26 = vector.load %arg8[%c0_19, %c0_20] : memref<8x128xf32, #tpu.memory_space<vmem>>, vector<8x128xf32>
    tpu.vector_store %arg8[%c0_19, %c0_20], %25 {strides = array<i32>} : memref<8x128xf32, #tpu.memory_space<vmem>>, vector<8x128xf32>,
    return
  }
  func.func @transform_0(%arg0: i32) -> (i32, i32) {
    %c0_i32 = arith.constant 0 : i32
    %c0_i32_0 = arith.constant 0 : i32
    return %arg0, %c0_i32 : i32, i32
  }
  func.func @transform_1(%arg0: i32) -> (i32, i32) {
    %c0_i32 = arith.constant 0 : i32
    %c0_i32_0 = arith.constant 0 : i32
    %c0_i32_1 = arith.constant 0 : i32
    return %c0_i32, %c0_i32_0 : i32, i32
  }
  func.func @transform_2(%arg0: i32) -> (i32, i32) {
    %c0_i32 = arith.constant 0 : i32
    %c0_i32_0 = arith.constant 0 : i32
    %c0_i32_1 = arith.constant 0 : i32
    return %c0_i32, %c0_i32_0 : i32, i32
  }
  func.func @transform_3(%arg0: i32) -> (i32, i32) {
    %c0_i32 = arith.constant 0 : i32
    %c0_i32_0 = arith.constant 0 : i32
    %c0_i32_1 = arith.constant 0 : i32
    return %c0_i32, %c0_i32_0 : i32, i32
  }
  func.func @transform_4(%arg0: i32) -> (i32, i32) {
    %c0_i32 = arith.constant 0 : i32
    %c0_i32_0 = arith.constant 0 : i32
    %c0_i32_1 = arith.constant 0 : i32
    return %c0_i32, %c0_i32_0 : i32, i32
  }
  func.func @transform_5(%arg0: i32) -> (i32, i32) {
    %c0_i32 = arith.constant 0 : i32
    %c0_i32_0 = arith.constant 0 : i32
    %c0_i32_1 = arith.constant 0 : i32
    return %c0_i32, %c0_i32_0 : i32, i32
  }
  func.func @transform_6(%arg0: i32) -> (i32, i32) {
    %c0_i32 = arith.constant 0 : i32
    %c0_i32_0 = arith.constant 0 : i32
    %c0_i32_1 = arith.constant 0 : i32
    return %c0_i32, %c0_i32_0 : i32, i32
  }
  func.func @transform_7(%arg0: i32) -> (i32, i32) {
    %c0_i32 = arith.constant 0 : i32
    %c0_i32_0 = arith.constant 0 : i32
    return %arg0, %c0_i32 : i32, i32
  }
}

</mosaic_0001>

<bundles_post_ra>
// kernel: tpu_custom_call.1
= control target key start
LH: loop header
LB: loop body
LE: loop exit
PB: predicated region body
PF: predicated region fallthrough
CT: control target
= control target key end

     0   :  { %12 = vsyncpa [#allocation3], 0  ;;  %s1618_s0 = inlined_call_operand.hbm [shape: f32[16,128], index: 0, kind: input, shape index: {}]   ;;  %s1619_s1 = inlined_call_operand.hbm [shape: f32[128,128], index: 1, kind: input, shape index: {}]   ;;  %s1620_s2 = inlined_call_operand.vmem [shape: f32[1,128], index: 2, kind: input, shape index: {}]   ;;  %s1621_s3 = inlined_call_operand.hbm [shape: f32[128,128], index: 3, kind: input, shape index: {}]   ;;  %s1622_s4 = inlined_call_operand.vmem [shape: f32[1,128], index: 4, kind: input, shape index: {}]   ;;  %s1623_s5 = inlined_call_operand.hbm [shape: f32[128,128], index: 5, kind: input, shape index: {}]   ;;  %s1624_s6 = inlined_call_operand.vmem [shape: f32[1,128], index: 6, kind: input, shape index: {}]   ;;  %s1625_s7 = inlined_call_operand.hbm [shape: f32[16,128], index: 7, kind: output, shape index: {}]  }
   0x1   :  { %14 = vsyncpa [#allocation3 + $0x1], 0 }
   0x2   :  { %15 = vsyncpa [#allocation6], 0 }
   0x3   :  { %16 = vsyncpa [#allocation9], 0 }
   0x4   :  { %17 = vsyncpa [#allocation4], 0 }
   0x5   :  { %19 = vsyncpa [#allocation4 + $0x1], 0  ;;  %s1309_s24 = smov 0   ;;  %s1311_s25 = smov 0  }
   0x6   :  { %s1313_s26 = smov 0   ;;  %s1315_s27 = smov 0  }
   0x7 LB: > { %s1330_s28 = sadd.s32 4294967295, %s1257_s27   ;;  %s738_s29 = sadd.s32 4294967294, %s1257_s27   ;;  %s1257_s27 = sphi %s1315_s27, %s1651_s27   ;;  %s1253_s26 = sphi %s1313_s26, %s1650_s26   ;;  %s1249_s25 = sphi %s1311_s25, %s1649_s25   ;;  %s1245_s24 = sphi %s1309_s24, %s1648_s24  }
   0x8   : > { %p45_p0 = scmp.ne.s32.totalorder %s1249_s25, %s1245_s24  ;;  %p1626_p1 = scmp.eq.s32.totalorder %s1330_s28, 0 }
   0x9   : > { %p201_p3 = scmp.eq.s32.totalorder %s738_s29, 1  ;;  %p739_p5 = scmp.ge.s32.totalorder %s1257_s27, 1 }
   0xa   : > { %p1339_p4 = por %p1626_p1, %p45_p0  ;;  %p208_p7 = scmp.lt.s32.totalorder %s1257_s27, 3 }
   0xb   : > { %p1344_p6 = por %p201_p3, %p45_p0  ;;  %s1259_s10 = smov [#allocation5]  }
   0xc   : > { %s1630_s30 = scalar_select %p1339_p4, 1, 0 }
   0xd   : > { %s1631_s8 = scalar_select %p1344_p6, 1, 0 }
   0xe   : > { %p1349_p8 = pnand %p739_p5, %p208_p7  ;;  %s220_s11 = sshll.u32 %s1259_s10, 4  ;;  %s1353_s11 = int_to_ptr.vmem [resolvable:$true] %s220_s11 }
   0xf   : > { %1632 = sst [smem:[#allocation15_spill]] %s1631_s8  ;;  %s1260_s13 = smov [#allocation7]  }
  0x10   : > { %s1633_s9 = scalar_select %p1349_p8, 1, 0 }
  0x11   : > { %p1003_p9 = pneg %p1349_p8  ;;  %s236_s14 = sshll.u32 %s1260_s13, 4  ;;  %s1364_s14 = int_to_ptr.vmem [resolvable:$true] %s236_s14 }
  0x12   : > { %s1261_s15 = smov [#allocation8]   ;;  %s1069_s19 = scalar_lea.hbm %s1619_s1, 2048 }
  0x13   : > { %p1360_p11 = pnand %p1003_p9, %p1626_p1  ;;  %s1366_s16 = sshll.u32 %s1261_s15, 4  ;;  %s253_s16 = int_to_ptr.vmem [resolvable:$true] %s1366_s16 }
  0x14   : > { %p1070_p12 = scmp.ne.s32.totalorder %s1619_s1, %s1069_s19  ;;  %p1076_p5 = scmp.lt.u32.totalorder %s1069_s19, %s1619_s1 }
  0x15   : > { %p1376_p13 = pneg %p1360_p11 }
  0x17   : > { %p1072_p0 = pnand %p1376_p13, %p1070_p12 }
  0x19   : > { %p1073_p3 = pneg %p1072_p0 }
  0x1b   : > { %p1078_p7 = pnand %p1076_p5, %p1073_p3 }
  0x1d   : > { %1081 = shalt.err (!%p1078_p7)
}
  0x1e   : > { %s1082_s10 = scalar_lea.vmem %s1353_s11, 2048  ;;  %p1090_p2 = scmp.lt.s32.totalorder %s1353_s11, %s1353_s11 }
  0x1f   : > { %p1083_p9 = scmp.ne.s32.totalorder %s1353_s11, %s1082_s10  ;;  %p1091_p6 = scmp.lt.s32.totalorder %s1082_s10, %s1082_s10 }
  0x21   : > { %p1085_p10 = pnand %p1083_p9, %p1376_p13  ;;  %p1092_p12 = por %p1091_p6, %p1090_p2 }
  0x23   : > { %p1086_p1 = pneg %p1085_p10 }
  0x25   : > { %p1093_p0 = pnand %p1092_p12, %p1086_p1 }
  0x27   : > { %1096 = shalt.err (!%p1093_p0)
}
  0x28   : > { %s1262_s13 = smov 128   ;;  %s1263_s15 = smov 8  }
  0x29   : > { %1006 = dma.hbm_to_vmem [thread:$0]  (!%p1360_p11), %s1619_s1, 2048, %s1353_s11, [#allocation6], %s1262_s13, %s1262_s13, %s1263_s15  }
  0x2a   : > { %s1097_s21 = scalar_lea.hbm %s1621_s3, 2048 }
  0x2b   : > { %p1098_p1 = scmp.ne.s32.totalorder %s1621_s3, %s1097_s21  ;;  %p1104_p10 = scmp.lt.u32.totalorder %s1097_s21, %s1621_s3 }
  0x2d   : > { %p1100_p2 = pnand %p1098_p1, %p1376_p13 }
  0x2f   : > { %p1101_p6 = pneg %p1100_p2 }
  0x31   : > { %p1106_p3 = pnand %p1104_p10, %p1101_p6 }
  0x33   : > { %1109 = shalt.err (!%p1106_p3)
}
  0x34   : > { %s1110_s11 = scalar_lea.vmem %s1364_s14, 2048  ;;  %p1118_p12 = scmp.lt.s32.totalorder %s1364_s14, %s1364_s14 }
  0x35   : > { %p1111_p5 = scmp.ne.s32.totalorder %s1364_s14, %s1110_s11  ;;  %p1119_p0 = scmp.lt.s32.totalorder %s1110_s11, %s1110_s11 }
  0x37   : > { %p1113_p7 = pnand %p1111_p5, %p1376_p13  ;;  %p1120_p1 = por %p1119_p0, %p1118_p12 }
  0x39   : > { %p1114_p9 = pneg %p1113_p7 }
  0x3b   : > { %p1121_p2 = pnand %p1120_p1, %p1114_p9 }
  0x3d   : > { %1124 = shalt.err (!%p1121_p2)
}
  0x3e   : > { %1009 = dma.hbm_to_vmem [thread:$0]  (!%p1360_p11), %s1621_s3, 2048, %s1364_s14, [#allocation6], %s1262_s13, %s1262_s13, %s1263_s15  }
  0x3f   : > { %s1125_s20 = scalar_lea.hbm %s1623_s5, 2048 }
  0x40   : > { %p1126_p6 = scmp.ne.s32.totalorder %s1623_s5, %s1125_s20  ;;  %p1132_p5 = scmp.lt.u32.totalorder %s1125_s20, %s1623_s5 }
  0x42   : > { %p1128_p10 = pnand %p1126_p6, %p1376_p13 }
  0x44   : > { %p1129_p3 = pneg %p1128_p10 }
  0x46   : > { %p1134_p7 = pnand %p1132_p5, %p1129_p3 }
  0x48   : > { %1137 = shalt.err (!%p1134_p7)
}
  0x49   : > { %s1138_s11 = scalar_lea.vmem %s253_s16, 2048  ;;  %p1146_p1 = scmp.lt.s32.totalorder %s253_s16, %s253_s16 }
  0x4a   : > { %p1139_p9 = scmp.ne.s32.totalorder %s253_s16, %s1138_s11  ;;  %p1147_p2 = scmp.lt.s32.totalorder %s1138_s11, %s1138_s11 }
  0x4c   : > { %p1141_p12 = pnand %p1139_p9, %p1376_p13  ;;  %p1148_p4 = por %p1147_p2, %p1146_p1 }
  0x4e   : > { %p1142_p0 = pneg %p1141_p12 }
  0x50   : > { %p1149_p8 = pnand %p1148_p4, %p1142_p0 }
  0x52   : > { %1152 = shalt.err (!%p1149_p8)
}
  0x53   : > { %1012 = dma.hbm_to_vmem [thread:$0]  (!%p1360_p11), %s1623_s5, 2048, %s253_s16, [#allocation9], %s1262_s13, %s1262_s13, %s1263_s15  }
  0x54   : > { %s1449_s22 = sadd.s32 1, %s1257_s27   ;;  %s32_s17 = sadd.s32 1, %s1253_s26 }
  0x55   : > { %s29_s12 = ssub.s32 %s1257_s27, %s1449_s22  ;;  %p39_p8 = scmp.ne.s32.totalorder %s1253_s26, %s1249_s25 }
  0x56   : > { %p30_p4 = scmp.eq.s32.totalorder %s29_s12, 0  ;;  %p40_p13 = scmp.eq.s32.totalorder %s1257_s27, 0 }
  0x57   : > { %p1024_p6 = scmp.lt.s32.totalorder %s1257_s27, 2  ;;  %p1636_p3 = scmp.eq.s32.totalorder %s1330_s28, 1 }
  0x58   : > { %s1459_s18 = scalar_select %p30_p4, %s1253_s26, %s32_s17  }
  0x59   : > { %p41_p10 = por %p40_p13, %p39_p8  ;;  %p1463_p5 = por %p1636_p3, %p39_p8 }
  0x5a   : > { %s269_s20 = sand.u32 1, %s1253_s26   ;;  %s745_s21 = sshll.u32 %s1257_s27, 7 }
  0x5b   : > { %s744_s16 = sshll.u32 %s269_s20, 3  ;;  %s1472_s23 = scalar_lea.hbm %s1618_s0, %s745_s21 }
  0x5c   : > { %s273_s29 = scalar_lea.vmem [#allocation2], %s744_s16  ;;  %p1474_p11 = pnand %p1024_p6, %p41_p10 }
  0x5d   : > { %s280_s10 = sshll.u32 %s273_s29, 4  ;;  %s270_s14 = scalar_lea.sflag [#allocation3], %s269_s20  ;;  %s1478_s10 = int_to_ptr.vmem [resolvable:$true] %s280_s10 }
  0x5e   : > { %s1153_s8 = scalar_lea.hbm %s1472_s23, 128  ;;  %p1155_p9 = pneg %p1474_p11 }
  0x5f   : > { %p1154_p7 = scmp.ne.s32.totalorder %s1472_s23, %s1153_s8  ;;  %s1158_s21 = scalar_lea.hbm %s1618_s0, 256 }
  0x60   : > { %p1159_p1 = scmp.lt.u32.totalorder %s1472_s23, %s1618_s0  ;;  %p1160_p2 = scmp.lt.u32.totalorder %s1158_s21, %s1153_s8 }
  0x61   : > { %p1156_p12 = pnand %p1155_p9, %p1154_p7  ;;  %p1162_p8 = scmp.lt.u32.totalorder %s1153_s8, %s1472_s23 }
  0x62   : > { %p1161_p4 = por %p1160_p2, %p1159_p1 }
  0x63   : > { %p1157_p0 = pneg %p1156_p12 }
  0x64   : > { %p1163_p13 = por %p1162_p8, %p1161_p4 }
  0x66   : > { %p1164_p6 = pnand %p1163_p13, %p1157_p0 }
  0x68   : > { %1167 = shalt.err (!%p1164_p6)
}
  0x69   : > { %s1168_s20 = scalar_lea.vmem %s1478_s10, 128  ;;  %s1264_s15 = smov [#allocation2]  }
  0x6a   : > { %p1169_p10 = scmp.ne.s32.totalorder %s1478_s10, %s1168_s20  ;;  %s1173_s29 = sshll.u32 %s1264_s15, 4  ;;  %s1174_s29 = int_to_ptr.vmem [resolvable:$false] %s1173_s29 }
  0x6b   : > { %s1175_s12 = scalar_lea.vmem %s1174_s29, 256  ;;  %p1176_p12 = scmp.lt.s32.totalorder %s1478_s10, %s1174_s29 }
  0x6c   : > { %p1171_p3 = pnand %p1169_p10, %p1155_p9  ;;  %p1177_p1 = scmp.lt.s32.totalorder %s1175_s12, %s1168_s20 }
  0x6e   : > { %p1172_p7 = pneg %p1171_p3  ;;  %p1178_p2 = por %p1177_p1, %p1176_p12 }
  0x70   : > { %p1179_p4 = pnand %p1178_p2, %p1172_p7 }
  0x72   : > { %1182 = shalt.err (!%p1179_p4)
}
  0x73   : > { %1016 = dma.hbm_to_vmem [thread:$0]  (!%p1474_p11), %s1472_s23, 128, %s1478_s10, %s270_s14  }
  0x74   : > { %p1639_p0 = scmp.ne.s32.totalorder %s1633_s9, 0 }
  0x75   : > { %s1508_s8 = sand.u32 (!%p1639_p0), 1, %s1249_s25   ;;  %p1640_p9 = scmp.ne.s32.totalorder (!%p1639_p0), %s1630_s30, 0 }
  0x76   : > { %289 = sbr.rel (%p1639_p0) target bundleno = 830 (0x33e), region = 48  ;;  %s747_s17 = sshll.u32 (!%p1639_p0), %s1508_s8, 3 }
  0x77   : > { %s292_s21 = scalar_lea.sflag (!%p1639_p0), [#allocation3], %s1508_s8  ;;  %s1514_s16 = scalar_lea.vmem (!%p1639_p0), [#allocation2], %s747_s17 }
  0x7d   : > { %1228 = dma.done.wait (%p1640_p9), %s292_s21, 128  }
  0x7e   : > { %1230 = vsyncadd (%p1640_p9), %s292_s21, 4294967168  ;;  %p1641_p11 = scmp.eq.s32.totalorder %s1330_s28, 0 }
  0x80   : > { %1232 = dma.done.wait (%p1641_p11), [#allocation6], 4096   ;;  %p1642_p8 = pmov %p1641_p11 }
  0x82   : > { %1234 = vsyncadd (%p1642_p8), [#allocation6], 4294963200  ;;  %p1643_p13 = pmov %p1642_p8 }
  0x83   : > { %p1644_p6 = pmov %p1642_p8 }
  0x84   : > { %1236 = dma.done.wait (%p1643_p13), [#allocation9], 2048  }
  0x85   : > { %1238 = vsyncadd (%p1644_p6), [#allocation9], 4294965248  ;;  %v1265_v0 = vmov 0.0|0.0   ;;  %vm1266_vm0 = vmmov 0   ;;  %v1267_v1 = vmov 0.0   ;;  %v339_v2 = vld [vmem:[#allocation5] sm:$0xff] }
  0x86   : > { %915 = vmatprep.subr.bf16.mxu0 %v1265_v0  ;;  %842 = vmatprep.mubr.msk.f32.mxu0 %vm1266_vm0, %v1267_v1  ;;  %v340_v3 = vld [vmem:[#allocation5 + $0x8] sm:$0xff]  ;;  %v341_v4 = vld [vmem:[#allocation5 + $0x10] sm:$0xff]  ;;  %v342_v6 = vld [vmem:[#allocation5 + $0x18] sm:$0xff]  ;;  %s756_s13 = sshll.u32 %s1330_s28, 7  ;;  %s337_s20 = scalar_lea.vmem [#allocation10], %s747_s17 }
  0x87   : > { %939 = vmatprep.subr.bf16.mxu1 %v1265_v0  ;;  %877 = vmatprep.mubr.msk.f32.mxu1 %vm1266_vm0, %v1267_v1  ;;  %v916_v5 = vpack.c.bf16 %v340_v3, %v339_v2  ;;  %v919_v7 = vpack.c.bf16 %v342_v6, %v341_v4  ;;  %v343_v8 = vld [vmem:[#allocation5 + $0x20] sm:$0xff]  ;;  %v344_v9 = vld [vmem:[#allocation5 + $0x28] sm:$0xff]  ;;  %v437_v12 = vld [vmem:[#allocation7 + $0x10] sm:$0xff]  ;;  %s639_s15 = sshll.u32 %s337_s20, 4  ;;  %s1574_s21 = scalar_lea.hbm %s1625_s7, %s756_s13  ;;  %s1576_s15 = int_to_ptr.vmem [resolvable:$true] %s639_s15 }
  0x88   : > { %v435_v10 = vld [vmem:[#allocation7] sm:$0xff]  ;;  %v436_v11 = vld [vmem:[#allocation7 + $0x8] sm:$0xff]  ;;  %v438_v13 = vld [vmem:[#allocation7 + $0x18] sm:$0xff]  ;;  %v922_v14 = vpack.c.bf16 %v344_v9, %v343_v8  ;;  %s1183_s30 = scalar_lea.vmem %s1576_s15, 128  ;;  %s1268_s28 = smov [#allocation10]  }
  0x89   : > { %917 = vmatpush3.bf16.msra.mxu0 %v916_v5  ;;  %v940_v15 = vpack.c.bf16 %v436_v11, %v435_v10  ;;  %v345_v16 = vld [vmem:[#allocation5 + $0x30] sm:$0xff]  ;;  %v346_v17 = vld [vmem:[#allocation5 + $0x38] sm:$0xff]  ;;  %v943_v18 = vpack.c.bf16 %v438_v13, %v437_v12  ;;  %v439_v19 = vld [vmem:[#allocation7 + $0x20] sm:$0xff]  ;;  %p1184_p10 = scmp.ne.s32.totalorder %s1576_s15, %s1183_s30  ;;  %s1187_s17 = sshll.u32 %s1268_s28, 4  ;;  %s1188_s17 = int_to_ptr.vmem [resolvable:$false] %s1187_s17 }
  0x8a   : > { %918 = vmatprep.subr.bf16.mxu0 %v1265_v0  ;;  %v440_v20 = vld [vmem:[#allocation7 + $0x28] sm:$0xff]  ;;  %v925_v21 = vpack.c.bf16 %v346_v17, %v345_v16  ;;  %v347_v22 = vld [vmem:[#allocation5 + $0x40] sm:$0xff]  ;;  %v441_v25 = vld [vmem:[#allocation7 + $0x30] sm:$0xff]  ;;  %s1189_s9 = scalar_lea.vmem %s1188_s17, 256  ;;  %p1190_p12 = scmp.lt.s32.totalorder %s1576_s15, %s1188_s17 }
  0x8b   : > { %941 = vmatpush3.bf16.msra.mxu1 %v940_v15  ;;  %v348_v23 = vld [vmem:[#allocation5 + $0x48] sm:$0xff]  ;;  %v946_v24 = vpack.c.bf16 %v440_v20, %v439_v19  ;;  %v442_v26 = vld [vmem:[#allocation7 + $0x38] sm:$0xff]  ;;  %v349_v28 = vld [vmem:[#allocation5 + $0x50] sm:$0xff]  ;;  %p1185_p3 = pnand %p1184_p10, %p1463_p5  ;;  %p1191_p1 = scmp.lt.s32.totalorder %s1189_s9, %s1183_s30 }
  0x8c   : > { %942 = vmatprep.subr.bf16.mxu1 %v1265_v0  ;;  %v928_v27 = vpack.c.bf16 %v348_v23, %v347_v22  ;;  %v350_v29 = vld [vmem:[#allocation5 + $0x58] sm:$0xff]  ;;  %v949_v30 = vpack.c.bf16 %v442_v26, %v441_v25  ;;  %v443_v31 = vld [vmem:[#allocation7 + $0x40] sm:$0xff]  ;;  %v444_v32 = vld [vmem:[#allocation7 + $0x48] sm:$0xff] }
  0x8d   : > { %920 = vmatpush3.bf16.msra.mxu0 %v919_v7  ;;  %v931_v33 = vpack.c.bf16 %v350_v29, %v349_v28  ;;  %v351_v34 = vld [vmem:[#allocation5 + $0x60] sm:$0xff]  ;;  %v352_v35 = vld [vmem:[#allocation5 + $0x68] sm:$0xff]  ;;  %v952_v36 = vpack.c.bf16 %v444_v32, %v443_v31  ;;  %v445_v37 = vld [vmem:[#allocation7 + $0x50] sm:$0xff]  ;;  %p1186_p7 = pneg %p1185_p3  ;;  %p1192_p2 = por %p1191_p1, %p1190_p12 }
  0x8e   : > { %921 = vmatprep.subr.bf16.mxu0 %v1265_v0  ;;  %v446_v38 = vld [vmem:[#allocation7 + $0x58] sm:$0xff]  ;;  %v934_v39 = vpack.c.bf16 %v352_v35, %v351_v34  ;;  %v353_v40 = vld [vmem:[#allocation5 + $0x70] sm:$0xff]  ;;  %v447_v43 = vld [vmem:[#allocation7 + $0x60] sm:$0xff] }
  0x8f   : > { %944 = vmatpush3.bf16.msra.mxu1 %v943_v18  ;;  %v354_v41 = vld [vmem:[#allocation5 + $0x78] sm:$0xff]  ;;  %v955_v42 = vpack.c.bf16 %v446_v38, %v445_v37  ;;  %v448_v44 = vld [vmem:[#allocation7 + $0x68] sm:$0xff]  ;;  %v449_v48 = vld [vmem:[#allocation7 + $0x70] sm:$0xff]  ;;  %p1193_p4 = pnand %p1192_p2, %p1186_p7 }
  0x90   : > { %945 = vmatprep.subr.bf16.mxu1 %v1265_v0  ;;  %v937_v45 = vpack.c.bf16 %v354_v41, %v353_v40  ;;  %v958_v46 = vpack.c.bf16 %v448_v44, %v447_v43  ;;  %v338_v47 = vld [vmem:[%s1514_s16] sm:$0xff]  ;;  %v531_v51 = vld [vmem:[#allocation8] sm:$0xff]  ;;  %v532_v52 = vld [vmem:[#allocation8 + $0x8] sm:$0xff]  ;;  %s626_s16 = scalar_lea.sflag [#allocation4], %s1508_s8 }
  0x91   : > { %923 = vmatpush3.bf16.msra.mxu0 %v922_v14  ;;  %v450_v49 = vld [vmem:[#allocation7 + $0x78] sm:$0xff]  ;;  %v533_v53 = vld [vmem:[#allocation8 + $0x10] sm:$0xff]  ;;  %v964_v54 = vpack.c.bf16 %v532_v52, %v531_v51  ;;  %v535_v57 = vld [vmem:[#allocation8 + $0x20] sm:$0xff] }
  0x92   : > { %924 = vmatprep.subr.bf16.mxu0 %v1265_v0  ;;  %v961_v50 = vpack.c.bf16 %v450_v49, %v449_v48  ;;  %v534_v55 = vld [vmem:[#allocation8 + $0x18] sm:$0xff]  ;;  %v536_v58 = vld [vmem:[#allocation8 + $0x28] sm:$0xff]  ;;  %v537_v60 = vld [vmem:[#allocation8 + $0x30] sm:$0xff] }
  0x93   : > { %947 = vmatpush3.bf16.msra.mxu1 %v946_v24  ;;  %v967_v56 = vpack.c.bf16 %v534_v55, %v533_v53  ;;  %v970_v59 = vpack.c.bf16 %v536_v58, %v535_v57  ;;  %v538_v61 = vld [vmem:[#allocation8 + $0x38] sm:$0xff]  ;;  %v539_v63 = vld [vmem:[#allocation8 + $0x40] sm:$0xff]  ;;  %v541_v3 = vld [vmem:[#allocation8 + $0x50] sm:$0xff] }
  0x94   : > { %948 = vmatprep.subr.bf16.mxu1 %v1265_v0  ;;  %v973_v62 = vpack.c.bf16 %v538_v61, %v537_v60  ;;  %v542_v4 = vld [vmem:[#allocation8 + $0x58] sm:$0xff]  ;;  %v543_v6 = vld [vmem:[#allocation8 + $0x60] sm:$0xff]  ;;  %v544_v7 = vld [vmem:[#allocation8 + $0x68] sm:$0xff] }
  0x95   : > { %926 = vmatpush3.bf16.msra.mxu0 %v925_v21  ;;  %v979_v5 = vpack.c.bf16 %v542_v4, %v541_v3  ;;  %v982_v8 = vpack.c.bf16 %v544_v7, %v543_v6  ;;  %v752_v9 = vld [vmem:[%s1620_s2] ss:$0 sm:$0xff]  ;;  %v546_v16 = vld [vmem:[#allocation8 + $0x78] sm:$0xff] }
  0x96   : > { %927 = vmatprep.subr.bf16.mxu0 %v1265_v0  ;;  %v545_v15 = vld [vmem:[#allocation8 + $0x70] sm:$0xff] }
  0x97   : > { %950 = vmatpush3.bf16.msra.mxu1 %v949_v30  ;;  %v985_v17 = vpack.c.bf16 %v546_v16, %v545_v15  ;;  %v754_v23 = vld [vmem:[%s1624_s6] ss:$0 sm:$0xff] }
  0x98   : > { %951 = vmatprep.subr.bf16.mxu1 %v1265_v0 }
  0x99   : > { %929 = vmatpush3.bf16.msra.mxu0 %v928_v27 }
  0x9a   : > { %930 = vmatprep.subr.bf16.mxu0 %v1265_v0 }
  0x9b   : > { %953 = vmatpush3.bf16.msra.mxu1 %v952_v36 }
  0x9c   : > { %954 = vmatprep.subr.bf16.mxu1 %v1265_v0 }
  0x9d   : > { %932 = vmatpush3.bf16.msra.mxu0 %v931_v33 }
  0x9e   : > { %933 = vmatprep.subr.bf16.mxu0 %v1265_v0 }
  0x9f   : > { %956 = vmatpush3.bf16.msra.mxu1 %v955_v42 }
  0xa0   : > { %957 = vmatprep.subr.bf16.mxu1 %v1265_v0 }
  0xa1   : > { %935 = vmatpush3.bf16.msra.mxu0 %v934_v39 }
  0xa2   : > { %936 = vmatprep.subr.bf16.mxu0 %v1265_v0 }
  0xa3   : > { %959 = vmatpush3.bf16.msra.mxu1 %v958_v46 }
  0xa4   : > { %960 = vmatprep.subr.bf16.mxu1 %v1265_v0 }
  0xa5   : > { %938 = vmatpush3.bf16.msra.mxu0 %v937_v45 }
  0xa6   : > { %963 = vmatprep.subr.bf16.mxu0 %v1265_v0 }
  0xa7   : > { %962 = vmatpush3.bf16.msra.mxu1 %v961_v50 }
  0xa8   : > { %843 = vmatmul.mubr.f32.vlgmr.msra.gmra.mrb[0].mxu0 %v338_v47 }
  0xa9   : > { %912 = vmatprep.mubr.msk.f32.mxu0 %vm1266_vm0, %v1267_v1  ;;  %965 = vmatpush3.bf16.msra.mxu0 %v964_v54  ;;  %v540_v1 = vld [vmem:[#allocation8 + $0x48] sm:$0xff] }
  0xaa   : > { %966 = vmatprep.subr.bf16.mxu0 %v1265_v0  ;;  %v976_v2 = vpack.c.bf16 %v540_v1, %v539_v63 }
  0xad   : > { %968 = vmatpush3.bf16.msra.mxu0 %v967_v56 }
  0xae   : > { %969 = vmatprep.subr.bf16.mxu0 %v1265_v0 }
  0xb1   : > { %971 = vmatpush3.bf16.msra.mxu0 %v970_v59 }
  0xb2   : > { %972 = vmatprep.subr.bf16.mxu0 %v1265_v0 }
  0xb5   : > { %974 = vmatpush3.bf16.msra.mxu0 %v973_v62 }
  0xb6   : > { %975 = vmatprep.subr.bf16.mxu0 %v1265_v0 }
  0xb9   : > { %977 = vmatpush3.bf16.msra.mxu0 %v976_v2 }
  0xba   : > { %978 = vmatprep.subr.bf16.mxu0 %v1265_v0 }
  0xbd   : > { %980 = vmatpush3.bf16.msra.mxu0 %v979_v5 }
  0xbe   : > { %981 = vmatprep.subr.bf16.mxu0 %v1265_v0 }
  0xc1   : > { %983 = vmatpush3.bf16.msra.mxu0 %v982_v8 }
  0xc2   : > { %984 = vmatprep.subr.bf16.mxu0 %v1265_v0  ;;  %v753_v0 = vld [vmem:[%s1622_s4] ss:$0 sm:$0xff] }
  0xc5   : > { %986 = vmatpush3.bf16.msra.mxu0 %v985_v17 }
 0x17b   : > { %v428_v10 = vpop.f32.mrb[0].mxu0 }
 0x17c   : > { %v429_v11 = vadd.f32 %v752_v9, %v428_v10  ;;  %v844_v12 = vpop.f32.mrb[1].mxu0 }
 0x17e   : > { %v433_v13 = vmul.f32 0.01, %v429_v11  ;;  %vm432_vm1 = vcmp.ge.f32.partialorder %v429_v11, 0.0 }
 0x180   : > { %v434_v14 = vsel %vm432_vm1, %v429_v11, %v433_v13 }
 0x181   : > { %878 = vmatmul.mubr.f32.vlgmr.msra.gmra.mrb[0].mxu1 %v434_v14 }
 0x254   : > { %v524_v18 = vpop.f32.mrb[0].mxu1 }
 0x255   : > { %v525_v19 = vadd.f32 %v753_v0, %v524_v18  ;;  %v879_v20 = vpop.f32.mrb[1].mxu1 }
 0x257   : > { %vm528_vm2 = vcmp.ge.f32.partialorder %v525_v19, 0.0  ;;  %v529_v21 = vmul.f32 0.01, %v525_v19 }
 0x259   : > { %v530_v22 = vsel %vm528_vm2, %v525_v19, %v529_v21 }
 0x25a   : > { %913 = vmatmul.mubr.f32.vlgmr.msra.gmra.mrb[2].mxu0 %v530_v22 }
 0x32d   : > { %v620_v24 = vpop.f32.mrb[2].mxu0 }
 0x32e   : > { %v621_v25 = vadd.f32 %v754_v23, %v620_v24  ;;  %v914_v26 = vpop.f32.mrb[3].mxu0 }
 0x330   : > { %624 = vst [vmem:[%s337_s20] sm:$0xff] %v621_v25 }
 0x331   : > { %1196 = shalt.err (!%p1193_p4)
}
 0x332   : > { %s1197_s8 = scalar_lea.hbm %s1574_s21, 128  ;;  %s1201_s11 = scalar_lea.hbm %s1625_s7, 256 }
 0x333   : > { %p1198_p0 = scmp.ne.s32.totalorder %s1574_s21, %s1197_s8  ;;  %p1202_p8 = scmp.lt.u32.totalorder %s1574_s21, %s1625_s7 }
 0x334   : > { %p1203_p13 = scmp.lt.u32.totalorder %s1201_s11, %s1197_s8  ;;  %p1205_p10 = scmp.lt.u32.totalorder %s1197_s8, %s1574_s21 }
 0x335   : > { %p1199_p9 = pnand %p1198_p0, %p1463_p5 }
 0x336   : > { %p1204_p6 = por %p1203_p13, %p1202_p8 }
 0x337   : > { %p1200_p11 = pneg %p1199_p9 }
 0x338   : > { %p1206_p3 = por %p1205_p10, %p1204_p6 }
 0x33a   : > { %p1207_p7 = pnand %p1206_p3, %p1200_p11 }
 0x33c   : > { %1210 = shalt.err (!%p1207_p7)
}
 0x33d   : > { %1001 = dma.vmem_to_hbm [thread:$0]  (%p1463_p5), %s1576_s15, 128, %s1574_s21, %s626_s16  }
 0x33e PF: > { %s1645_s20 = sld [smem:[#allocation15_spill]]  ;;  %s651_s29 = sand.u32 1, %s1245_s24  }
 0x33f   : > { %p1647_p1 = scmp.ge.s32.totalorder %s1257_s27, 2  ;;  %s652_s12 = scalar_lea.sflag [#allocation4], %s651_s29 }
 0x344   : > { %p1646_p12 = scmp.ne.s32.totalorder %s1645_s20, 0 }
 0x346   : > { %p1018_p2 = pnand %p1647_p1, %p1646_p12 }
 0x348   : > { %1240 = dma.done.wait (!%p1018_p2), %s652_s12, 128  }
 0x349   : > { %1242 = vsyncadd (!%p1018_p2), %s652_s12, 4294967168  ;;  %p22_p4 = scmp.ge.s32.totalorder %s1449_s22, 4   ;;  %s1648_s24 = smov %s1249_s25 }
 0x34a   : > { %s1649_s25 = smov %s1253_s26  ;;  %s1650_s26 = smov %s1459_s18 }
 0x34b   : > { %s1651_s27 = smov %s1449_s22  ;;  %24 = sbr.rel (!%p22_p4) target bundleno = 7 (0x7), region = 105 }
 0x352   :  { %657 = vsyncpa [#allocation3], 1 }
 0x353   :  { %659 = vsyncpa [#allocation3 + $0x1], 1 }
 0x354   :  { %660 = vsyncpa [#allocation6], 1 }
 0x355   :  { %661 = vsyncpa [#allocation9], 1 }
 0x356   :  { %662 = vsyncpa [#allocation4], 1 }
 0x357   :  { %664 = vsyncpa [#allocation4 + $0x1], 1 }

</bundles_post_ra>
